<compile_context>
chip_gen: v5e
topology: v5e:2x2
jax: 0.10.0
libtpu: 0.0.40
codegen_flags: <defaults>
</compile_context>

<pallas_src>
import functools

import jax
import jax.numpy as jnp
from jax.experimental import pallas as pl
from jax.experimental.pallas import tpu as pltpu

_VALUES = (0.2, 0.3, 0.4, 0.5, 0.6, 0.6)
_P = _VALUES[3]                 # 0.5, matching the original deterministic pick
_NUM_SAMPLES = 6                # six independent dropout draws, then mean
_HASHES_PER_ELEM = 3            # 3 hashes x 2 sixteen-bit compares = 6 masks


def _mix32(h):
    """lowbias32-style avalanche mix on uint32 (pure VPU int ops)."""
    h = h ^ (h >> 16)
    h = h * jnp.uint32(0x7FEB352D)
    h = h ^ (h >> 15)
    h = h * jnp.uint32(0x846CA68B)
    h = h ^ (h >> 16)
    return h


def _ensemble_dropout_kernel(x_ref, o_ref, *, keep_prob, seed):
    """x_ref/o_ref: VMEM (TM, b) tiles of the (a, b) input/output."""
    tm, b = x_ref.shape
    tile = pl.program_id(0)

    # Global linear element id for every element of this tile (int32 wraparound
    # is harmless: it only feeds the hash).
    row = jax.lax.broadcasted_iota(jnp.int32, (tm, b), 0)
    col = jax.lax.broadcasted_iota(jnp.int32, (tm, b), 1)
    elem = (tile * tm + row) * b + col

    # Counter-based PRNG state: unique per (element, draw) and mixed with the
    # (static) seed.  Using the *global* element id keeps tiles decorrelated.
    seed_mix = (int(seed) * 0x9E3779B9 + 0x6A09E667) & 0xFFFFFFFF
    base = elem.astype(jnp.uint32) * jnp.uint32(_HASHES_PER_ELEM) + jnp.uint32(seed_mix)

    # 16-bit Bernoulli threshold (quantizes keep_prob to 1/65536; exact for
    # the 0.4..0.8 keep probabilities used by this module's p table at 0.5).
    thresh = jnp.uint32(int(round(keep_prob * 65536.0)))
    mask16 = jnp.uint32(0xFFFF)

    # Integer keep-count accumulation: 6 compares + 5 int adds per element.
    count = jnp.zeros((tm, b), jnp.int32)
    for j in range(_HASHES_PER_ELEM):           # static, fully unrolled
        h = _mix32(base + jnp.uint32(j))
        count = (count
                 + ((h & mask16) < thresh).astype(jnp.int32)
                 + ((h >> 16) < thresh).astype(jnp.int32))

    # Single multiply touching x:  out = x * count / (6 * keep_prob)
    scale = 1.0 / (float(_NUM_SAMPLES) * keep_prob)
    x = x_ref[...]
    o_ref[...] = (x.astype(jnp.float32)
                  * (count.astype(jnp.float32) * scale)).astype(o_ref.dtype)


def _pick_block_rows(a, row_bytes):
    """Largest row tile (multiple of 8, dividing a) with <= ~2 MiB per buffer.

    2 MiB/buffer * (in + out) * double-buffering <= 8 MiB VMEM, comfortably
    under the scoped-VMEM defaults of v5e (16 MiB) and v6e/v7x (32 MiB).
    """
    target_bytes = 2 << 20
    tm = min(a, max(8, target_bytes // max(row_bytes, 1)))
    tm = max(8, (tm // 8) * 8)
    while tm > 8 and a % tm != 0:
        tm -= 8
    if a % tm != 0:
        tm = a  # small / ragged row count: fall back to a single tile
    return tm


def ensemble_dropout(x, seed=0, p=_P, block_rows=None):
    a, b = x.shape
    keep_prob = 1.0 - p
    if block_rows is None:
        block_rows = _pick_block_rows(a, b * x.dtype.itemsize)
    assert a % block_rows == 0, (a, block_rows)
    grid = (a // block_rows,)

    kernel = functools.partial(
        _ensemble_dropout_kernel, keep_prob=keep_prob, seed=int(seed))

    return pl.pallas_call(
        kernel,
        out_shape=jax.ShapeDtypeStruct((a, b), x.dtype),
        grid=grid,
        in_specs=[pl.BlockSpec((block_rows, b), lambda i: (i, 0))],
        out_specs=pl.BlockSpec((block_rows, b), lambda i: (i, 0)),
        compiler_params=pltpu.CompilerParams(
            dimension_semantics=("parallel",)),   # megacore sharding on v7x
    )(x)


if __name__ == "__main__":
    key = jax.random.PRNGKey(0)
    a, b = 16, 128  # (batch, features); b is lane-dense (multiple of 128)
    x = jax.random.normal(key, (a, b), dtype=jnp.float32)

    # block_rows=8 -> a 2-step row grid, exercising the pipelined/tiled path.
    out = ensemble_dropout(x, seed=0, block_rows=8)
    out = jax.block_until_ready(out)

    assert out.shape == (a, b), out.shape
    assert out.dtype == x.dtype, out.dtype

    keep = 1.0 - _P
    scale = 1.0 / (float(_NUM_SAMPLES) * keep)
    # Every output element is x * k * scale with k in {0..6}.
    assert bool(jnp.all(jnp.abs(out) <= jnp.abs(x) / keep + 1e-4))
    valid = jnp.abs(x) > 1e-3
    counts = jnp.where(valid, out / jnp.where(valid, x, 1.0) / scale, 3.0)
    assert bool(jnp.all((counts > -0.1) & (counts < 6.1)))
    # Masks actually vary (Binomial(6, 0.5) has std ~1.22 per element).
    assert float(jnp.std(counts)) > 0.3

    print("KERNEL_OK")
</pallas_src>

<mosaic_0001>
module attributes {stable_mosaic.version = 11 : i64} {
  func.func @_ensemble_dropout_kernel(%arg0: i32, %arg1: memref<8x128xf32, #tpu.memory_space<vmem>>, %arg2: memref<8x128xf32, #tpu.memory_space<vmem>>) attributes {dimension_semantics = [#tpu.dimension_semantics<parallel>], iteration_bounds = array<i64: 2>, scalar_prefetch = 0 : i64, scratch_operands = 0 : i64, tpu.core_type = #tpu.core_type<tc>, window_params = [{transform_indices = @transform_0, window_bounds = array<i64: 8, 128>}, {transform_indices = @transform_1, window_bounds = array<i64: 8, 128>}]} {
    %0 = tpu.iota {dimensions = array<i32: 0>} : vector<8x128xi32>
    %1 = tpu.iota {dimensions = array<i32: 1>} : vector<8x128xi32>
    %c8_i32 = arith.constant 8 : i32
    %2 = arith.muli %arg0, %c8_i32 : i32
    %3 = vector.broadcast %2 : i32 to vector<8x128xi32>
    %4 = arith.addi %3, %0 : vector<8x128xi32>
    %c128_i32 = arith.constant 128 : i32
    %5 = vector.broadcast %c128_i32 : i32 to vector<8x128xi32>
    %6 = arith.muli %4, %5 : vector<8x128xi32>
    %7 = arith.addi %6, %1 : vector<8x128xi32>
    %c3_i32 = arith.constant 3 : i32
    %8 = vector.broadcast %c3_i32 : i32 to vector<8x128xi32>
    %9 = arith.muli %7, %8 : vector<8x128xi32>
    %c1779033703_i32 = arith.constant 1779033703 : i32
    %10 = vector.broadcast %c1779033703_i32 : i32 to vector<8x128xi32>
    %11 = arith.addi %9, %10 : vector<8x128xi32>
    %c0_i32 = arith.constant 0 : i32
    %12 = vector.broadcast %c0_i32 : i32 to vector<8x128xi32>
    %c0_i32_0 = arith.constant 0 : i32
    %13 = vector.broadcast %c0_i32_0 : i32 to vector<8x128xi32>
    %14 = arith.addi %11, %13 : vector<8x128xi32>
    %c16_i32 = arith.constant 16 : i32
    %15 = vector.broadcast %c16_i32 : i32 to vector<8x128xi32>
    %16 = arith.shrui %14, %15 : vector<8x128xi32>
    %17 = arith.xori %14, %16 : vector<8x128xi32>
    %c2146121005_i32 = arith.constant 2146121005 : i32
    %18 = vector.broadcast %c2146121005_i32 : i32 to vector<8x128xi32>
    %19 = arith.muli %17, %18 : vector<8x128xi32>
    %c15_i32 = arith.constant 15 : i32
    %20 = vector.broadcast %c15_i32 : i32 to vector<8x128xi32>
    %21 = arith.shrui %19, %20 : vector<8x128xi32>
    %22 = arith.xori %19, %21 : vector<8x128xi32>
    %c-2073254261_i32 = arith.constant -2073254261 : i32
    %23 = vector.broadcast %c-2073254261_i32 : i32 to vector<8x128xi32>
    %24 = arith.muli %22, %23 : vector<8x128xi32>
    %c16_i32_1 = arith.constant 16 : i32
    %25 = vector.broadcast %c16_i32_1 : i32 to vector<8x128xi32>
    %26 = arith.shrui %24, %25 : vector<8x128xi32>
    %27 = arith.xori %24, %26 : vector<8x128xi32>
    %c65535_i32 = arith.constant 65535 : i32
    %28 = vector.broadcast %c65535_i32 : i32 to vector<8x128xi32>
    %29 = arith.andi %27, %28 : vector<8x128xi32>
    %c32768_i32 = arith.constant 32768 : i32
    %30 = vector.broadcast %c32768_i32 : i32 to vector<8x128xi32>
    %31 = arith.cmpi ult, %29, %30 : vector<8x128xi32>
    %32 = arith.extui %31 : vector<8x128xi1> to vector<8x128xi32>
    %33 = arith.addi %12, %32 : vector<8x128xi32>
    %c16_i32_2 = arith.constant 16 : i32
    %34 = vector.broadcast %c16_i32_2 : i32 to vector<8x128xi32>
    %35 = arith.shrui %27, %34 : vector<8x128xi32>
    %c32768_i32_3 = arith.constant 32768 : i32
    %36 = vector.broadcast %c32768_i32_3 : i32 to vector<8x128xi32>
    %37 = arith.cmpi ult, %35, %36 : vector<8x128xi32>
    %38 = arith.extui %37 : vector<8x128xi1> to vector<8x128xi32>
    %39 = arith.addi %33, %38 : vector<8x128xi32>
    %c1_i32 = arith.constant 1 : i32
    %40 = vector.broadcast %c1_i32 : i32 to vector<8x128xi32>
    %41 = arith.addi %11, %40 : vector<8x128xi32>
    %c16_i32_4 = arith.constant 16 : i32
    %42 = vector.broadcast %c16_i32_4 : i32 to vector<8x128xi32>
    %43 = arith.shrui %41, %42 : vector<8x128xi32>
    %44 = arith.xori %41, %43 : vector<8x128xi32>
    %c2146121005_i32_5 = arith.constant 2146121005 : i32
    %45 = vector.broadcast %c2146121005_i32_5 : i32 to vector<8x128xi32>
    %46 = arith.muli %44, %45 : vector<8x128xi32>
    %c15_i32_6 = arith.constant 15 : i32
    %47 = vector.broadcast %c15_i32_6 : i32 to vector<8x128xi32>
    %48 = arith.shrui %46, %47 : vector<8x128xi32>
    %49 = arith.xori %46, %48 : vector<8x128xi32>
    %c-2073254261_i32_7 = arith.constant -2073254261 : i32
    %50 = vector.broadcast %c-2073254261_i32_7 : i32 to vector<8x128xi32>
    %51 = arith.muli %49, %50 : vector<8x128xi32>
    %c16_i32_8 = arith.constant 16 : i32
    %52 = vector.broadcast %c16_i32_8 : i32 to vector<8x128xi32>
    %53 = arith.shrui %51, %52 : vector<8x128xi32>
    %54 = arith.xori %51, %53 : vector<8x128xi32>
    %c65535_i32_9 = arith.constant 65535 : i32
    %55 = vector.broadcast %c65535_i32_9 : i32 to vector<8x128xi32>
    %56 = arith.andi %54, %55 : vector<8x128xi32>
    %c32768_i32_10 = arith.constant 32768 : i32
    %57 = vector.broadcast %c32768_i32_10 : i32 to vector<8x128xi32>
    %58 = arith.cmpi ult, %56, %57 : vector<8x128xi32>
    %59 = arith.extui %58 : vector<8x128xi1> to vector<8x128xi32>
    %60 = arith.addi %39, %59 : vector<8x128xi32>
    %c16_i32_11 = arith.constant 16 : i32
    %61 = vector.broadcast %c16_i32_11 : i32 to vector<8x128xi32>
    %62 = arith.shrui %54, %61 : vector<8x128xi32>
    %c32768_i32_12 = arith.constant 32768 : i32
    %63 = vector.broadcast %c32768_i32_12 : i32 to vector<8x128xi32>
    %64 = arith.cmpi ult, %62, %63 : vector<8x128xi32>
    %65 = arith.extui %64 : vector<8x128xi1> to vector<8x128xi32>
    %66 = arith.addi %60, %65 : vector<8x128xi32>
    %c2_i32 = arith.constant 2 : i32
    %67 = vector.broadcast %c2_i32 : i32 to vector<8x128xi32>
    %68 = arith.addi %11, %67 : vector<8x128xi32>
    %c16_i32_13 = arith.constant 16 : i32
    %69 = vector.broadcast %c16_i32_13 : i32 to vector<8x128xi32>
    %70 = arith.shrui %68, %69 : vector<8x128xi32>
    %71 = arith.xori %68, %70 : vector<8x128xi32>
    %c2146121005_i32_14 = arith.constant 2146121005 : i32
    %72 = vector.broadcast %c2146121005_i32_14 : i32 to vector<8x128xi32>
    %73 = arith.muli %71, %72 : vector<8x128xi32>
    %c15_i32_15 = arith.constant 15 : i32
    %74 = vector.broadcast %c15_i32_15 : i32 to vector<8x128xi32>
    %75 = arith.shrui %73, %74 : vector<8x128xi32>
    %76 = arith.xori %73, %75 : vector<8x128xi32>
    %c-2073254261_i32_16 = arith.constant -2073254261 : i32
    %77 = vector.broadcast %c-2073254261_i32_16 : i32 to vector<8x128xi32>
    %78 = arith.muli %76, %77 : vector<8x128xi32>
    %c16_i32_17 = arith.constant 16 : i32
    %79 = vector.broadcast %c16_i32_17 : i32 to vector<8x128xi32>
    %80 = arith.shrui %78, %79 : vector<8x128xi32>
    %81 = arith.xori %78, %80 : vector<8x128xi32>
    %c65535_i32_18 = arith.constant 65535 : i32
    %82 = vector.broadcast %c65535_i32_18 : i32 to vector<8x128xi32>
    %83 = arith.andi %81, %82 : vector<8x128xi32>
    %c32768_i32_19 = arith.constant 32768 : i32
    %84 = vector.broadcast %c32768_i32_19 : i32 to vector<8x128xi32>
    %85 = arith.cmpi ult, %83, %84 : vector<8x128xi32>
    %86 = arith.extui %85 : vector<8x128xi1> to vector<8x128xi32>
    %87 = arith.addi %66, %86 : vector<8x128xi32>
    %c16_i32_20 = arith.constant 16 : i32
    %88 = vector.broadcast %c16_i32_20 : i32 to vector<8x128xi32>
    %89 = arith.shrui %81, %88 : vector<8x128xi32>
    %c32768_i32_21 = arith.constant 32768 : i32
    %90 = vector.broadcast %c32768_i32_21 : i32 to vector<8x128xi32>
    %91 = arith.cmpi ult, %89, %90 : vector<8x128xi32>
    %92 = arith.extui %91 : vector<8x128xi1> to vector<8x128xi32>
    %93 = arith.addi %87, %92 : vector<8x128xi32>
    %c0 = arith.constant 0 : index
    %c0_22 = arith.constant 0 : index
    %94 = vector.load %arg1[%c0, %c0_22] : memref<8x128xf32, #tpu.memory_space<vmem>>, vector<8x128xf32>
    %95 = arith.sitofp %93 : vector<8x128xi32> to vector<8x128xf32>
    %cst = arith.constant 0.333333343 : f32
    %96 = vector.broadcast %cst : f32 to vector<8x128xf32>
    %97 = arith.mulf %95, %96 : vector<8x128xf32>
    %98 = arith.mulf %94, %97 : vector<8x128xf32>
    %c0_23 = arith.constant 0 : index
    %c0_24 = arith.constant 0 : index
    %99 = vector.load %arg2[%c0_23, %c0_24] : memref<8x128xf32, #tpu.memory_space<vmem>>, vector<8x128xf32>
    tpu.vector_store %arg2[%c0_23, %c0_24], %98 {strides = array<i32>} : memref<8x128xf32, #tpu.memory_space<vmem>>, vector<8x128xf32>,
    return
  }
  func.func @transform_0(%arg0: i32) -> (i32, i32) {
    %c0_i32 = arith.constant 0 : i32
    %c0_i32_0 = arith.constant 0 : i32
    return %arg0, %c0_i32 : i32, i32
  }
  func.func @transform_1(%arg0: i32) -> (i32, i32) {
    %c0_i32 = arith.constant 0 : i32
    %c0_i32_0 = arith.constant 0 : i32
    return %arg0, %c0_i32 : i32, i32
  }
}

</mosaic_0001>

<bundles_post_ra>
// kernel: tpu_custom_call.1
= control target key start
LH: loop header
LB: loop body
LE: loop exit
PB: predicated region body
PF: predicated region fallthrough
CT: control target
= control target key end

     0   :  { %6 = vsyncpa [#allocation3], 0  ;;  %s610_s0 = inlined_call_operand.hbm [shape: f32[16,128], index: 0, kind: input, shape index: {}]   ;;  %s611_s1 = inlined_call_operand.hbm [shape: f32[16,128], index: 1, kind: output, shape index: {}]  }
   0x1   :  { %8 = vsyncpa [#allocation3 + $0x1], 0 }
   0x2   :  { %9 = vsyncpa [#allocation4], 0 }
   0x3   :  { %11 = vsyncpa [#allocation4 + $0x1], 0  ;;  %s472_s6 = smov 0   ;;  %s474_s7 = smov 0  }
   0x4   :  { %s476_s8 = smov 0   ;;  %s478_s9 = smov 0  }
   0x5 LB: > { %s493_s10 = sadd.s32 4294967295, %s459_s9   ;;  %s297_s11 = sadd.s32 4294967294, %s459_s9   ;;  %s459_s9 = sphi %s478_s9, %s621_s9   ;;  %s455_s8 = sphi %s476_s8, %s620_s8   ;;  %s451_s7 = sphi %s474_s7, %s619_s7   ;;  %s447_s6 = sphi %s472_s6, %s618_s6  }
   0x6   : > { %s497_s12 = sadd.s32 1, %s459_s9   ;;  %s24_s13 = sadd.s32 1, %s455_s8 }
   0x7   : > { %s21_s14 = ssub.s32 %s459_s9, %s497_s12  ;;  %p31_p0 = scmp.ne.s32.totalorder %s455_s8, %s451_s7 }
   0x8   : > { %p22_p1 = scmp.eq.s32.totalorder %s21_s14, 0  ;;  %p32_p2 = scmp.eq.s32.totalorder %s459_s9, 0 }
   0x9   : > { %p37_p3 = scmp.ne.s32.totalorder %s451_s7, %s447_s6  ;;  %p38_p4 = scmp.eq.s32.totalorder %s493_s10, 0 }
   0xa   : > { %s509_s15 = scalar_select %p22_p1, %s455_s8, %s24_s13  }
   0xb   : > { %p511_p5 = por %p32_p2, %p31_p0  ;;  %p515_p6 = por %p38_p4, %p37_p3 }
   0xc   : > { %p61_p7 = scmp.eq.s32.totalorder %s493_s10, 1  ;;  %p67_p8 = scmp.eq.s32.totalorder %s297_s11, 1 }
   0xd   : > { %p328_p10 = scmp.lt.s32.totalorder %s459_s9, 2  ;;  %s87_s20 = sand.u32 1, %s455_s8  }
   0xe   : > { %p522_p11 = por %p61_p7, %p31_p0  ;;  %p526_p12 = por %p67_p8, %p37_p3 }
   0xf   : > { %s301_s21 = sshll.u32 %s459_s9, 3  ;;  %s300_s22 = sshll.u32 %s87_s20, 3 }
  0x10   : > { %s95_s25 = scalar_lea.hbm %s610_s0, %s301_s21  ;;  %s91_s27 = scalar_lea.vmem [#allocation2], %s300_s22 }
  0x11   : > { %s97_s26 = sshll.u32 %s95_s25, 4  ;;  %s99_s28 = sshll.u32 %s91_s27, 4  ;;  %s98_s26 = int_to_ptr.hbm [resolvable:$true] %s97_s26  ;;  %s100_s28 = int_to_ptr.vmem [resolvable:$true] %s99_s28 }
  0x12   : > { %p537_p13 = pnand %p328_p10, %p511_p5  ;;  %p302_p0 = scmp.ge.s32.totalorder %s459_s9, 1 }
  0x13   : > { %p104_p1 = scmp.lt.s32.totalorder %s459_s9, 3  ;;  %s88_s30 = scalar_lea.sflag [#allocation3], %s87_s20 }
  0x14   : > { %s363_s2 = sshra.s32 %s98_s26, 4  ;;  %p367_p3 = pneg %p537_p13  ;;  %s364_s2 = int_to_ptr.hbm [resolvable:$true] %s363_s2 }
  0x15   : > { %s365_s3 = scalar_lea.hbm %s364_s2, 8  ;;  %s370_s11 = scalar_lea.hbm %s610_s0, 16 }
  0x16   : > { %p366_p2 = scmp.ne.s32.totalorder %s364_s2, %s365_s3  ;;  %p371_p5 = scmp.lt.s32.totalorder %s364_s2, %s610_s0 }
  0x17   : > { %p372_p8 = scmp.lt.s32.totalorder %s370_s11, %s365_s3 }
  0x18   : > { %p368_p4 = pnand %p367_p3, %p366_p2 }
  0x19   : > { %p373_p10 = por %p372_p8, %p371_p5 }
  0x1a   : > { %p369_p7 = pneg %p368_p4 }
  0x1c   : > { %p374_p9 = pnand %p373_p10, %p369_p7 }
  0x1e   : > { %377 = shalt.err (!%p374_p9)
}
  0x1f   : > { %323 = dma.hbm_to_vmem [thread:$0]  (!%p537_p13), %s98_s26, 128, %s100_s28, %s88_s30  }
  0x20   : > { %p105_p2 = pnand %p302_p0, %p104_p1 }
  0x21   : > { %s558_s16 = sand.u32 (!%p105_p2), 1, %s451_s7  }
  0x22   : > { %108 = sbr.rel (%p105_p2) target bundleno = 95 (0x5f), region = 24  ;;  %s303_s20 = sshll.u32 (!%p105_p2), %s558_s16, 3 }
  0x23   : > { %s111_s21 = scalar_lea.sflag (!%p105_p2), [#allocation3], %s558_s16  ;;  %s564_s22 = scalar_lea.vmem (!%p105_p2), [#allocation2], %s303_s20 }
  0x27   : > { %438 = dma.done.wait (%p515_p6), %s111_s21, 128  }
  0x28   : > { %440 = vsyncadd (%p515_p6), %s111_s21, 4294967168  ;;  %v134_v0 = vlaneseq  ;;  %s305_s23 = sshll.u32 %s493_s10, 3  ;;  %v461_v45 = vmov 0   ;;  %v206_v60 = vld [vmem:[%s564_s22] sm:$0xff]  ;;  %s133_s26 = scalar_lea.vmem [#allocation5], %s303_s20 }
  0x29   : > { %v139_v1 = vstv %s305_s23  ;;  %s222_s25 = scalar_lea.hbm %s611_s1, %s305_s23  ;;  %s224_s27 = sshll.u32 %s133_s26, 4  ;;  %s225_s27 = int_to_ptr.vmem [resolvable:$true] %s224_s27 }
  0x2a   : > { %v135_v2 = vshrl.u32 %v134_v0, 7  ;;  %v137_v3 = vand.u32 127, %v134_v0  ;;  %s226_s28 = sshll.u32 %s222_s25, 4  ;;  %s212_s29 = scalar_lea.sflag [#allocation4], %s558_s16  ;;  %s227_s28 = int_to_ptr.hbm [resolvable:$true] %s226_s28 }
  0x2b   : > { %s407_s30 = sshra.s32 %s227_s28, 4  ;;  %s413_s4 = scalar_lea.hbm %s611_s1, 16  ;;  %s408_s30 = int_to_ptr.hbm [resolvable:$true] %s407_s30 }
  0x2c   : > { %v140_v4 = vadd.s32 %v139_v1, %v135_v2  ;;  %s409_s10 = scalar_lea.hbm %s408_s30, 8  ;;  %p414_p0 = scmp.lt.s32.totalorder %s408_s30, %s611_s1 }
  0x2d   : > { %p410_p6 = scmp.ne.s32.totalorder %s408_s30, %s409_s10  ;;  %p415_p1 = scmp.lt.s32.totalorder %s413_s4, %s409_s10 }
  0x2e   : > { %v141_v5 = vmul.u32 128, %v140_v4 }
  0x2f   : > { %p411_p9 = pnand %p410_p6, %p522_p11  ;;  %p416_p3 = por %p415_p1, %p414_p0 }
  0x30   : > { %v142_v6 = vadd.s32 %v141_v5, %v137_v3 }
  0x31   : > { %p412_p13 = pneg %p411_p9 }
  0x32   : > { %v143_v7 = vmul.u32 3, %v142_v6 }
  0x33   : > { %p417_p4 = pnand %p416_p3, %p412_p13 }
  0x34   : > { %v144_v8 = vadd.s32 1779033703, %v143_v7 }
  0x36   : > { %v145_v9 = vshrl.u32 %v144_v8, 16  ;;  %v164_v10 = vadd.s32 1, %v144_v8  ;;  %v185_v11 = vadd.s32 2, %v144_v8 }
  0x38   : > { %v146_v12 = vxor.u32 %v145_v9, %v144_v8  ;;  %v165_v13 = vshrl.u32 %v164_v10, 16  ;;  %v186_v14 = vshrl.u32 %v185_v11, 16 }
  0x3a   : > { %v147_v15 = vmul.u32 2146121005, %v146_v12  ;;  %v166_v16 = vxor.u32 %v165_v13, %v164_v10  ;;  %v187_v17 = vxor.u32 %v186_v14, %v185_v11 }
  0x3c   : > { %v148_v18 = vshrl.u32 %v147_v15, 15  ;;  %v167_v19 = vmul.u32 2146121005, %v166_v16  ;;  %v188_v20 = vmul.u32 2146121005, %v187_v17 }
  0x3e   : > { %v149_v21 = vxor.u32 %v148_v18, %v147_v15  ;;  %v168_v22 = vshrl.u32 %v167_v19, 15  ;;  %v189_v23 = vshrl.u32 %v188_v20, 15 }
  0x40   : > { %v150_v24 = vmul.u32 2221713035, %v149_v21  ;;  %v169_v25 = vxor.u32 %v168_v22, %v167_v19  ;;  %v190_v26 = vxor.u32 %v189_v23, %v188_v20 }
  0x42   : > { %v151_v27 = vshrl.u32 %v150_v24, 16  ;;  %v170_v28 = vmul.u32 2221713035, %v169_v25  ;;  %v191_v29 = vmul.u32 2221713035, %v190_v26 }
  0x44   : > { %v152_v30 = vxor.u32 %v151_v27, %v150_v24  ;;  %v171_v31 = vshrl.u32 %v170_v28, 16  ;;  %v192_v32 = vshrl.u32 %v191_v29, 16 }
  0x46   : > { %v153_v33 = vand.u32 65535, %v152_v30  ;;  %v158_v34 = vshrl.u32 %v152_v30, 16  ;;  %v172_v35 = vxor.u32 %v171_v31, %v170_v28  ;;  %v193_v36 = vxor.u32 %v192_v32, %v191_v29 }
  0x48   : > { %v306_v37 = vxor.u32 2147483648, %v153_v33  ;;  %v307_v38 = vxor.u32 2147483648, %v158_v34  ;;  %v173_v39 = vand.u32 65535, %v172_v35  ;;  %v179_v40 = vshrl.u32 %v172_v35, 16 }
  0x49   : > { %v194_v41 = vand.u32 65535, %v193_v36  ;;  %v200_v42 = vshrl.u32 %v193_v36, 16 }
  0x4a   : > { %vm156_vm0 = vcmp.lt.s32.totalorder %v306_v37, 2147516416  ;;  %vm161_vm1 = vcmp.lt.s32.totalorder %v307_v38, 2147516416  ;;  %v308_v43 = vxor.u32 2147483648, %v173_v39  ;;  %v309_v44 = vxor.u32 2147483648, %v179_v40 }
  0x4b   : > { %v157_v46 = vsel %vm156_vm0, 1, %v461_v45  ;;  %v162_v47 = vsel %vm161_vm1, 1, %v461_v45  ;;  %v310_v48 = vxor.u32 2147483648, %v194_v41  ;;  %v311_v49 = vxor.u32 2147483648, %v200_v42 }
  0x4c   : > { %v163_v50 = vadd.s32 %v162_v47, %v157_v46  ;;  %vm176_vm2 = vcmp.lt.s32.totalorder %v308_v43, 2147516416  ;;  %vm182_vm3 = vcmp.lt.s32.totalorder %v309_v44, 2147516416 }
  0x4d   : > { %v177_v51 = vsel %vm176_vm2, 1, %v461_v45  ;;  %v183_v52 = vsel %vm182_vm3, 1, %v461_v45  ;;  %vm197_vm4 = vcmp.lt.s32.totalorder %v310_v48, 2147516416  ;;  %vm203_vm5 = vcmp.lt.s32.totalorder %v311_v49, 2147516416 }
  0x4e   : > { %v178_v53 = vadd.s32 %v177_v51, %v163_v50  ;;  %v198_v54 = vsel %vm197_vm4, 1, %v461_v45  ;;  %v204_v56 = vsel %vm203_vm5, 1, %v461_v45 }
  0x50   : > { %v184_v55 = vadd.s32 %v183_v52, %v178_v53 }
  0x52   : > { %v199_v57 = vadd.s32 %v198_v54, %v184_v55 }
  0x54   : > { %v205_v58 = vadd.s32 %v204_v56, %v199_v57 }
  0x56   : > { %v207_v59 = vcvt.s32.f32 %v205_v58 }
  0x58   : > { %v208_v61 = vmul.f32 0.33333334, %v207_v59 }
  0x5a   : > { %v209_v62 = vmul.f32 %v208_v61, %v206_v60 }
  0x5c   : > { %210 = vst [vmem:[%s133_s26] sm:$0xff] %v209_v62 }
  0x5d   : > { %420 = shalt.err (!%p417_p4)
}
  0x5e   : > { %318 = dma.vmem_to_hbm [thread:$0]  (%p522_p11), %s225_s27, 128, %s227_s28, %s212_s29  }
  0x5f PF: > { %s238_s13 = sand.u32 1, %s447_s6   ;;  %p617_p7 = scmp.ge.s32.totalorder %s459_s9, 2 }
  0x60   : > { %s239_s14 = scalar_lea.sflag [#allocation4], %s238_s13 }
  0x61   : > { %p325_p5 = pnand %p617_p7, %p526_p12 }
  0x63   : > { %p326_p8 = pneg %p325_p5 }
  0x65   : > { %442 = dma.done.wait (%p326_p8), %s239_s14, 128  }
  0x66   : > { %444 = vsyncadd (%p326_p8), %s239_s14, 4294967168  ;;  %p14_p10 = scmp.ge.s32.totalorder %s497_s12, 4   ;;  %s618_s6 = smov %s451_s7 }
  0x67   : > { %s619_s7 = smov %s455_s8  ;;  %s620_s8 = smov %s509_s15 }
  0x68   : > { %s621_s9 = smov %s497_s12  ;;  %16 = sbr.rel (!%p14_p10) target bundleno = 5 (0x5), region = 69 }
  0x6d   :  { %245 = vsyncpa [#allocation3], 1 }
  0x6e   :  { %247 = vsyncpa [#allocation3 + $0x1], 1 }
  0x6f   :  { %248 = vsyncpa [#allocation4], 1 }
  0x70   :  { %250 = vsyncpa [#allocation4 + $0x1], 1 }

</bundles_post_ra>
